<compile_context>
chip_gen: v6e
topology: v6e:2x2x1
jax: 0.10.0
libtpu: 0.0.40
codegen_flags: <defaults>
</compile_context>

<pallas_src>
import functools

import jax
import jax.numpy as jnp
from jax import lax
from jax.experimental import pallas as pl
from jax.experimental.pallas import tpu as pltpu

EPS = 1e-5  # nn.BatchNorm1d default eps


def _conv_bn_relu_kernel(x_hbm, w_ref, g_ref, b_ref, o_ref,
                         xv_ref, xp_ref, xcol_ref, dma_sem, *,
                         stride: int, ksize: int, pad: int,
                         n_batch: int, c_in: int, l_in: int, l_out: int,
                         compute_dtype):
    """One grid step = one block of output channels (conv + BN(train) + ReLU).

    x_hbm   : (N, C_in, L)         raw HBM ref (memory_space=pl.ANY)
    w_ref   : (tco, K*C_in)        VMEM weight block, f = k*C_in + c
    g_ref   : (tco, 1)             VMEM BN gamma block
    b_ref   : (tco, 1)             VMEM BN beta block
    o_ref   : (N, tco, L_out)      VMEM output block, native NCL layout
    xv_ref  : (N, C_in, L)         VMEM scratch: single staged copy of x
    xp_ref  : (N, C_in, L+2*pad)   VMEM scratch: zero-padded x
    xcol_ref: (N, K*C_in, L_out)   VMEM scratch: im2col patches (built once)
    """
    # ---- one-time: DMA x to VMEM and build the im2col patches ---------------
    # Scratch persists across grid steps; requires the channel-block axis to run
    # sequentially on a single core -> dimension_semantics=("arbitrary",).
    @pl.when(pl.program_id(0) == 0)
    def _build_patches():
        cp = pltpu.make_async_copy(x_hbm, xv_ref, dma_sem.at[0])
        cp.start()
        cp.wait()
        # Only the 2*pad boundary columns are zero-filled; the interior is a
        # straight copy (with optional cast to the matmul dtype).
        if pad > 0:
            xp_ref[:, :, :pad] = jnp.zeros((n_batch, c_in, pad), xp_ref.dtype)
            xp_ref[:, :, pad + l_in:] = jnp.zeros((n_batch, c_in, pad),
                                                  xp_ref.dtype)
        xp_ref[:, :, pad:pad + l_in] = xv_ref[...].astype(xp_ref.dtype)
        x_p = xp_ref[...]                                  # (N, C_in, L+2*pad)
        for kk in range(ksize):                            # K is small / static
            if stride == 1:
                tap = lax.slice(x_p, (0, 0, kk), (n_batch, c_in, kk + l_out))
            else:
                # TODO(synk): lane-strided slice lowers to cross-lane copies;
                # reshape L as (L_out, stride) if strided convs matter for perf.
                tap = lax.slice(x_p, (0, 0, kk),
                                (n_batch, c_in, kk + (l_out - 1) * stride + 1),
                                (1, 1, stride))
            xcol_ref[:, kk * c_in:(kk + 1) * c_in, :] = tap   # row f = kk*C_in + c

    # ---- conv as per-sample 2-D MXU matmuls + fused BN statistics -----------
    w = w_ref[...]                                          # (tco, K*C_in)
    tco = w.shape[0]
    accs = []
    s = jnp.zeros((tco, 1), jnp.float32)
    ss = jnp.zeros((tco, 1), jnp.float32)
    for nn in range(n_batch):                               # static batch loop
        a = jnp.dot(w, xcol_ref[nn], preferred_element_type=jnp.float32)
        accs.append(a)                                      # (tco, L_out) f32
        s = s + jnp.sum(a, axis=1, keepdims=True)           # fused stat pass
        ss = ss + jnp.sum(a * a, axis=1, keepdims=True)

    # ---- training-mode BatchNorm1d + ReLU epilogue ---------------------------
    # Biased variance over (N, L_out), eps=1e-5.  Conv bias is omitted: a
    # per-channel constant cancels exactly against the batch mean (training-mode
    # BN only).  Single-pass E[x^2]-E[x]^2 in f32; switch to the shifted/Welford
    # form if |mean| >> std at realistic activation scales.
    inv_m = 1.0 / float(n_batch * l_out)
    mean = s * inv_m                                        # (tco, 1)
    var = ss * inv_m - mean * mean                          # (tco, 1)
    scale = g_ref[...] * lax.rsqrt(var + EPS)               # (tco, 1)
    shift = b_ref[...] - mean * scale                       # (tco, 1)
    for nn in range(n_batch):
        o_ref[nn] = jnp.maximum(accs[nn] * scale + shift,
                                0.0).astype(o_ref.dtype)


def _pick_channel_block(c_out: int, cap: int = 256) -> int:
    """Full C_out when small; else the largest multiple-of-8 divisor <= cap
    (falls back to a single full block, which is always BlockSpec-legal)."""
    if c_out <= cap:
        return c_out
    for t in range(cap, 7, -1):
        if t % 8 == 0 and c_out % t == 0:
            return t
    return c_out


def conv1d_bn_relu(x, weight, bias, gamma, beta, *, stride: int, pad: int,
                   matmul_dtype=jnp.float32,
                   vmem_limit_bytes: int = 48 * 1024 * 1024):
    """Pallas TPU Conv1d -> BatchNorm1d(training) -> ReLU.

    matmul_dtype: jnp.float32 (default, matches the f32 PyTorch module) or
      jnp.bfloat16 on v6e/v7x for 2x MXU rate; BN stats/epilogue stay f32.
    vmem_limit_bytes: 48 MiB fits v7x (64 MiB/TC); raise toward ~96 MiB on
      v5e/v6e (128 MiB VMEM) when using larger channel / length blocks.
    """
    n, c_in, l = x.shape
    c_out, c_in_w, k = weight.shape
    assert c_in == c_in_w, "weight C_in mismatch"
    l_out = (l + 2 * pad - k) // stride + 1
    assert l_out >= 1

    # Layout plumbing only on tiny per-channel tensors; x and out keep their
    # native NCL layouts (no extra HBM round trips).
    w2 = jnp.transpose(weight, (0, 2, 1)).reshape(c_out, k * c_in) \
            .astype(matmul_dtype)                 # w2[o, kk*C_in + c] = w[o, c, kk]
    g2 = gamma.reshape(c_out, 1).astype(jnp.float32)
    b2 = beta.reshape(c_out, 1).astype(jnp.float32)
    del bias  # cancels exactly against the training-mode batch mean

    tco = _pick_channel_block(c_out)
    grid = (pl.cdiv(c_out, tco),)

    kern = functools.partial(
        _conv_bn_relu_kernel, stride=stride, ksize=k, pad=pad,
        n_batch=n, c_in=c_in, l_in=l, l_out=l_out, compute_dtype=matmul_dtype)

    out = pl.pallas_call(
        kern,
        out_shape=jax.ShapeDtypeStruct((n, c_out, l_out), jnp.float32),
        grid_spec=pltpu.PrefetchScalarGridSpec(
            num_scalar_prefetch=0,
            grid=grid,
            in_specs=[
                pl.BlockSpec(memory_space=pl.ANY),                 # x: stays in HBM
                pl.BlockSpec((tco, k * c_in), lambda i: (i, 0)),   # weight block
                pl.BlockSpec((tco, 1), lambda i: (i, 0)),          # gamma block
                pl.BlockSpec((tco, 1), lambda i: (i, 0)),          # beta block
            ],
            # Output written directly in (N, C_out, L_out): lane dim is L_out, so
            # writeback is lane-dense whenever L_out is a multiple of 128; tiny
            # L_out pays masked stores instead of an extra HBM transpose pass.
            out_specs=pl.BlockSpec((n, tco, l_out), lambda i: (0, i, 0)),
            scratch_shapes=[
                pltpu.VMEM((n, c_in, l), x.dtype),              # staged x (1x)
                pltpu.VMEM((n, c_in, l + 2 * pad), matmul_dtype),  # padded x
                pltpu.VMEM((n, k * c_in, l_out), matmul_dtype),    # im2col patches
                pltpu.SemaphoreType.DMA((1,)),
            ],
        ),
        compiler_params=pltpu.CompilerParams(
            # "arbitrary": the hoisted one-time patch build at program_id==0
            # requires this axis to run sequentially on one core.
            # TODO(synk): for v7x dual-TC utilization, add a parallel L_out-tile
            # grid axis with two-phase BN partial sums (+ per-core patch build).
            dimension_semantics=("arbitrary",),
            vmem_limit_bytes=vmem_limit_bytes,
        ),
    )(x, w2, g2, b2)
    return out


def _reference(x, weight, bias, gamma, beta, *, stride: int, pad: int):
    """Pure-JAX reference (matches PyTorch Conv1d+BatchNorm1d(train)+ReLU)."""
    y = lax.conv_general_dilated(
        x, weight,
        window_strides=(stride,), padding=[(pad, pad)],
        dimension_numbers=("NCH", "OIH", "NCH"),
    ) + bias.reshape(1, -1, 1)
    mean = jnp.mean(y, axis=(0, 2), keepdims=True)
    var = jnp.mean((y - mean) ** 2, axis=(0, 2), keepdims=True)
    y = (y - mean) / jnp.sqrt(var + EPS)
    y = y * gamma.reshape(1, -1, 1) + beta.reshape(1, -1, 1)
    return jnp.maximum(y, 0.0)


if __name__ == "__main__":
    # Conv1d(in_ch=4, out_ch=8, kernel=3, stride=1, pad=1) at small shapes.
    N, C_IN, L = 2, 4, 16
    C_OUT, K, STRIDE, PAD = 8, 3, 1, 1

    key = jax.random.PRNGKey(0)
    kx, kw, kb = jax.random.split(key, 3)

    x = jax.random.normal(kx, (N, C_IN, L), dtype=jnp.float32)
    fan_in = C_IN * K
    bound = 1.0 / (fan_in ** 0.5)
    weight = jax.random.uniform(kw, (C_OUT, C_IN, K), jnp.float32, -bound, bound)
    bias = jax.random.uniform(kb, (C_OUT,), jnp.float32, -bound, bound)
    gamma = jnp.ones((C_OUT,), jnp.float32)   # BatchNorm1d default weight
    beta = jnp.zeros((C_OUT,), jnp.float32)   # BatchNorm1d default bias

    out = conv1d_bn_relu(x, weight, bias, gamma, beta, stride=STRIDE, pad=PAD)
    out = jax.block_until_ready(out)

    ref = _reference(x, weight, bias, gamma, beta, stride=STRIDE, pad=PAD)
    assert out.shape == (N, C_OUT, (L + 2 * PAD - K) // STRIDE + 1)
    assert jnp.allclose(out, ref, atol=2e-4, rtol=2e-4), "mismatch vs reference"

    print("KERNEL_OK")
</pallas_src>

<mosaic_0001>
module attributes {stable_mosaic.version = 11 : i64} {
  func.func @_conv_bn_relu_kernel(%arg0: i32, %arg1: memref<2x4x16xf32, #tpu.memory_space<any>>, %arg2: memref<8x12xf32, #tpu.memory_space<vmem>>, %arg3: memref<8x1xf32, #tpu.memory_space<vmem>>, %arg4: memref<8x1xf32, #tpu.memory_space<vmem>>, %arg5: memref<2x8x16xf32, #tpu.memory_space<vmem>>, %arg6: memref<2x4x16xf32, #tpu.memory_space<vmem>>, %arg7: memref<2x4x18xf32, #tpu.memory_space<vmem>>, %arg8: memref<2x12x16xf32, #tpu.memory_space<vmem>>, %arg9: memref<1x!tpu.dma_semaphore, #tpu.memory_space<semaphore_mem>>) attributes {dimension_semantics = [#tpu.dimension_semantics<arbitrary>], iteration_bounds = array<i64: 1>, scalar_prefetch = 0 : i64, scratch_operands = 4 : i64, tpu.core_type = #tpu.core_type<tc>, window_params = [{}, {transform_indices = @transform_1, window_bounds = array<i64: 8, 12>}, {transform_indices = @transform_2, window_bounds = array<i64: 8, 1>}, {transform_indices = @transform_3, window_bounds = array<i64: 8, 1>}, {transform_indices = @transform_4, window_bounds = array<i64: 2, 8, 16>}]} {
    %c0_i32 = arith.constant 0 : i32
    %0 = arith.cmpi eq, %arg0, %c0_i32 : i32
    %1 = arith.extui %0 : i1 to i32
    %c0_i32_0 = arith.constant 0 : i32
    %2 = arith.cmpi ne, %1, %c0_i32_0 : i32
    scf.if %2 {
      %c0_i32_29 = arith.constant 0 : i32
      %58 = tpu.memref_slice %arg9[%c0_i32_29] : memref<1x!tpu.dma_semaphore, #tpu.memory_space<semaphore_mem>> -> memref<1x!tpu.dma_semaphore, #tpu.memory_space<semaphore_mem>>
      %59 = tpu.memref_squeeze %58 : memref<1x!tpu.dma_semaphore, #tpu.memory_space<semaphore_mem>> -> memref<!tpu.dma_semaphore, #tpu.memory_space<semaphore_mem>>
      tpu.enqueue_dma source(%arg1 : memref<2x4x16xf32, #tpu.memory_space<any>>) target(%arg6 : memref<2x4x16xf32, #tpu.memory_space<vmem>>) target_semaphore(%59 : memref<!tpu.dma_semaphore, #tpu.memory_space<semaphore_mem>>)
      %c0_i32_30 = arith.constant 0 : i32
      %60 = tpu.memref_slice %arg9[%c0_i32_30] : memref<1x!tpu.dma_semaphore, #tpu.memory_space<semaphore_mem>> -> memref<1x!tpu.dma_semaphore, #tpu.memory_space<semaphore_mem>>
      %61 = tpu.memref_squeeze %60 : memref<1x!tpu.dma_semaphore, #tpu.memory_space<semaphore_mem>> -> memref<!tpu.dma_semaphore, #tpu.memory_space<semaphore_mem>>
      tpu.wait_dma2 semaphore(%61 : memref<!tpu.dma_semaphore, #tpu.memory_space<semaphore_mem>>) src(%arg1 : memref<2x4x16xf32, #tpu.memory_space<any>>) dst(%arg6 : memref<2x4x16xf32, #tpu.memory_space<vmem>>)
      %cst_31 = arith.constant 0.000000e+00 : f32
      %62 = vector.broadcast %cst_31 : f32 to vector<2x4x1xf32>
      %c0_32 = arith.constant 0 : index
      %c0_33 = arith.constant 0 : index
      %c0_34 = arith.constant 0 : index
      %63 = vector.load %arg7[%c0_32, %c0_33, %c0_34] : memref<2x4x18xf32, #tpu.memory_space<vmem>>, vector<2x4x1xf32>
      tpu.vector_store %arg7[%c0_32, %c0_33, %c0_34], %62 {strides = array<i32>} : memref<2x4x18xf32, #tpu.memory_space<vmem>>, vector<2x4x1xf32>,
      %cst_35 = arith.constant 0.000000e+00 : f32
      %64 = vector.broadcast %cst_35 : f32 to vector<2x4x1xf32>
      %c0_36 = arith.constant 0 : index
      %c0_37 = arith.constant 0 : index
      %c17 = arith.constant 17 : index
      %65 = vector.load %arg7[%c0_36, %c0_37, %c17] : memref<2x4x18xf32, #tpu.memory_space<vmem>>, vector<2x4x1xf32>
      tpu.vector_store %arg7[%c0_36, %c0_37, %c17], %64 {strides = array<i32>} : memref<2x4x18xf32, #tpu.memory_space<vmem>>, vector<2x4x1xf32>,
      %c0_38 = arith.constant 0 : index
      %c0_39 = arith.constant 0 : index
      %c0_40 = arith.constant 0 : index
      %66 = vector.load %arg6[%c0_38, %c0_39, %c0_40] : memref<2x4x16xf32, #tpu.memory_space<vmem>>, vector<2x4x16xf32>
      %c0_41 = arith.constant 0 : index
      %c0_42 = arith.constant 0 : index
      %c1_43 = arith.constant 1 : index
      %67 = vector.load %arg7[%c0_41, %c0_42, %c1_43] : memref<2x4x18xf32, #tpu.memory_space<vmem>>, vector<2x4x16xf32>
      tpu.vector_store %arg7[%c0_41, %c0_42, %c1_43], %66 {strides = array<i32>} : memref<2x4x18xf32, #tpu.memory_space<vmem>>, vector<2x4x16xf32>,
      %c0_44 = arith.constant 0 : index
      %c0_45 = arith.constant 0 : index
      %c0_46 = arith.constant 0 : index
      %68 = vector.load %arg7[%c0_44, %c0_45, %c0_46] : memref<2x4x18xf32, #tpu.memory_space<vmem>>, vector<2x4x18xf32>
      %69 = vector.extract_strided_slice %68 {offsets = [0, 0, 0], sizes = [2, 4, 16], strides = [1, 1, 1]} : vector<2x4x18xf32> to vector<2x4x16xf32>
      %c0_47 = arith.constant 0 : index
      %c0_48 = arith.constant 0 : index
      %c0_49 = arith.constant 0 : index
      %70 = vector.load %arg8[%c0_47, %c0_48, %c0_49] : memref<2x12x16xf32, #tpu.memory_space<vmem>>, vector<2x4x16xf32>
      tpu.vector_store %arg8[%c0_47, %c0_48, %c0_49], %69 {strides = array<i32>} : memref<2x12x16xf32, #tpu.memory_space<vmem>>, vector<2x4x16xf32>,
      %71 = vector.extract_strided_slice %68 {offsets = [0, 0, 1], sizes = [2, 4, 16], strides = [1, 1, 1]} : vector<2x4x18xf32> to vector<2x4x16xf32>
      %c0_50 = arith.constant 0 : index
      %c4 = arith.constant 4 : index
      %c0_51 = arith.constant 0 : index
      %72 = vector.load %arg8[%c0_50, %c4, %c0_51] : memref<2x12x16xf32, #tpu.memory_space<vmem>>, vector<2x4x16xf32>
      tpu.vector_store %arg8[%c0_50, %c4, %c0_51], %71 {strides = array<i32>} : memref<2x12x16xf32, #tpu.memory_space<vmem>>, vector<2x4x16xf32>,
      %73 = vector.extract_strided_slice %68 {offsets = [0, 0, 2], sizes = [2, 4, 16], strides = [1, 1, 1]} : vector<2x4x18xf32> to vector<2x4x16xf32>
      %c0_52 = arith.constant 0 : index
      %c8 = arith.constant 8 : index
      %c0_53 = arith.constant 0 : index
      %74 = vector.load %arg8[%c0_52, %c8, %c0_53] : memref<2x12x16xf32, #tpu.memory_space<vmem>>, vector<2x4x16xf32>
      tpu.vector_store %arg8[%c0_52, %c8, %c0_53], %73 {strides = array<i32>} : memref<2x12x16xf32, #tpu.memory_space<vmem>>, vector<2x4x16xf32>,
    } else {
    }
    %c0 = arith.constant 0 : index
    %c0_1 = arith.constant 0 : index
    %3 = vector.load %arg2[%c0, %c0_1] : memref<8x12xf32, #tpu.memory_space<vmem>>, vector<8x12xf32>
    %cst = arith.constant 0.000000e+00 : f32
    %4 = vector.broadcast %cst : f32 to vector<8x1xf32>
    %cst_2 = arith.constant 0.000000e+00 : f32
    %5 = vector.broadcast %cst_2 : f32 to vector<8x1xf32>
    %c0_3 = arith.constant 0 : index
    %c0_4 = arith.constant 0 : index
    %c0_5 = arith.constant 0 : index
    %6 = vector.load %arg8[%c0_3, %c0_4, %c0_5] : memref<2x12x16xf32, #tpu.memory_space<vmem>>, vector<1x12x16xf32>
    %7 = vector.shape_cast %6 : vector<1x12x16xf32> to vector<12x16xf32>
    %cst_6 = arith.constant dense<0.000000e+00> : vector<8x16xf32>
    %8 = tpu.matmul %3, %7, %cst_6 {dimension_numbers = #tpu.dot_dimension_numbers<[1], [0], [0], [1], [0, 0, 1, 1], [], []>} : vector<8x12xf32>, vector<12x16xf32>, vector<8x16xf32> -> vector<8x16xf32>
    %cst_7 = arith.constant dense<0.000000e+00> : vector<8xf32>
    %9 = vector.multi_reduction <add>, %8, %cst_7 [1] : vector<8x16xf32> to vector<8xf32>
    %10 = vector.shape_cast %9 : vector<8xf32> to vector<8x1xf32>
    %11 = arith.addf %4, %10 : vector<8x1xf32>
    %12 = arith.mulf %8, %8 : vector<8x16xf32>
    %cst_8 = arith.constant dense<0.000000e+00> : vector<8xf32>
    %13 = vector.multi_reduction <add>, %12, %cst_8 [1] : vector<8x16xf32> to vector<8xf32>
    %14 = vector.shape_cast %13 : vector<8xf32> to vector<8x1xf32>
    %15 = arith.addf %5, %14 : vector<8x1xf32>
    %c1 = arith.constant 1 : index
    %c0_9 = arith.constant 0 : index
    %c0_10 = arith.constant 0 : index
    %16 = vector.load %arg8[%c1, %c0_9, %c0_10] : memref<2x12x16xf32, #tpu.memory_space<vmem>>, vector<1x12x16xf32>
    %17 = vector.shape_cast %16 : vector<1x12x16xf32> to vector<12x16xf32>
    %cst_11 = arith.constant dense<0.000000e+00> : vector<8x16xf32>
    %18 = tpu.matmul %3, %17, %cst_11 {dimension_numbers = #tpu.dot_dimension_numbers<[1], [0], [0], [1], [0, 0, 1, 1], [], []>} : vector<8x12xf32>, vector<12x16xf32>, vector<8x16xf32> -> vector<8x16xf32>
    %cst_12 = arith.constant dense<0.000000e+00> : vector<8xf32>
    %19 = vector.multi_reduction <add>, %18, %cst_12 [1] : vector<8x16xf32> to vector<8xf32>
    %20 = vector.shape_cast %19 : vector<8xf32> to vector<8x1xf32>
    %21 = arith.addf %11, %20 : vector<8x1xf32>
    %22 = arith.mulf %18, %18 : vector<8x16xf32>
    %cst_13 = arith.constant dense<0.000000e+00> : vector<8xf32>
    %23 = vector.multi_reduction <add>, %22, %cst_13 [1] : vector<8x16xf32> to vector<8xf32>
    %24 = vector.shape_cast %23 : vector<8xf32> to vector<8x1xf32>
    %25 = arith.addf %15, %24 : vector<8x1xf32>
    %cst_14 = arith.constant 3.125000e-02 : f32
    %26 = vector.broadcast %cst_14 : f32 to vector<8x1xf32>
    %27 = arith.mulf %21, %26 : vector<8x1xf32>
    %cst_15 = arith.constant 3.125000e-02 : f32
    %28 = vector.broadcast %cst_15 : f32 to vector<8x1xf32>
    %29 = arith.mulf %25, %28 : vector<8x1xf32>
    %30 = arith.mulf %27, %27 : vector<8x1xf32>
    %31 = arith.subf %29, %30 : vector<8x1xf32>
    %c0_16 = arith.constant 0 : index
    %c0_17 = arith.constant 0 : index
    %32 = vector.load %arg3[%c0_16, %c0_17] : memref<8x1xf32, #tpu.memory_space<vmem>>, vector<8x1xf32>
    %cst_18 = arith.constant 9.99999974E-6 : f32
    %33 = vector.broadcast %cst_18 : f32 to vector<8x1xf32>
    %34 = arith.addf %31, %33 : vector<8x1xf32>
    %35 = math.rsqrt %34 : vector<8x1xf32>
    %36 = arith.mulf %32, %35 : vector<8x1xf32>
    %c0_19 = arith.constant 0 : index
    %c0_20 = arith.constant 0 : index
    %37 = vector.load %arg4[%c0_19, %c0_20] : memref<8x1xf32, #tpu.memory_space<vmem>>, vector<8x1xf32>
    %38 = arith.mulf %27, %36 : vector<8x1xf32>
    %39 = arith.subf %37, %38 : vector<8x1xf32>
    %40 = vector.broadcast %36 : vector<8x1xf32> to vector<8x16xf32>
    %41 = arith.mulf %8, %40 : vector<8x16xf32>
    %42 = vector.broadcast %39 : vector<8x1xf32> to vector<8x16xf32>
    %43 = arith.addf %41, %42 : vector<8x16xf32>
    %cst_21 = arith.constant 0.000000e+00 : f32
    %44 = vector.broadcast %cst_21 : f32 to vector<8x16xf32>
    %45 = arith.maximumf %43, %44 : vector<8x16xf32>
    %c0_22 = arith.constant 0 : index
    %c0_23 = arith.constant 0 : index
    %c0_24 = arith.constant 0 : index
    %46 = vector.load %arg5[%c0_22, %c0_23, %c0_24] : memref<2x8x16xf32, #tpu.memory_space<vmem>>, vector<1x8x16xf32>
    %47 = vector.shape_cast %46 : vector<1x8x16xf32> to vector<8x16xf32>
    %48 = vector.shape_cast %45 : vector<8x16xf32> to vector<1x8x16xf32>
    tpu.vector_store %arg5[%c0_22, %c0_23, %c0_24], %48 {strides = array<i32>} : memref<2x8x16xf32, #tpu.memory_space<vmem>>, vector<1x8x16xf32>,
    %49 = vector.broadcast %36 : vector<8x1xf32> to vector<8x16xf32>
    %50 = arith.mulf %18, %49 : vector<8x16xf32>
    %51 = vector.broadcast %39 : vector<8x1xf32> to vector<8x16xf32>
    %52 = arith.addf %50, %51 : vector<8x16xf32>
    %cst_25 = arith.constant 0.000000e+00 : f32
    %53 = vector.broadcast %cst_25 : f32 to vector<8x16xf32>
    %54 = arith.maximumf %52, %53 : vector<8x16xf32>
    %c1_26 = arith.constant 1 : index
    %c0_27 = arith.constant 0 : index
    %c0_28 = arith.constant 0 : index
    %55 = vector.load %arg5[%c1_26, %c0_27, %c0_28] : memref<2x8x16xf32, #tpu.memory_space<vmem>>, vector<1x8x16xf32>
    %56 = vector.shape_cast %55 : vector<1x8x16xf32> to vector<8x16xf32>
    %57 = vector.shape_cast %54 : vector<8x16xf32> to vector<1x8x16xf32>
    tpu.vector_store %arg5[%c1_26, %c0_27, %c0_28], %57 {strides = array<i32>} : memref<2x8x16xf32, #tpu.memory_space<vmem>>, vector<1x8x16xf32>,
    return
  }
  func.func @transform_1(%arg0: i32) -> (i32, i32) {
    %c0_i32 = arith.constant 0 : i32
    %c0_i32_0 = arith.constant 0 : i32
    return %arg0, %c0_i32 : i32, i32
  }
  func.func @transform_2(%arg0: i32) -> (i32, i32) {
    %c0_i32 = arith.constant 0 : i32
    %c0_i32_0 = arith.constant 0 : i32
    return %arg0, %c0_i32 : i32, i32
  }
  func.func @transform_3(%arg0: i32) -> (i32, i32) {
    %c0_i32 = arith.constant 0 : i32
    %c0_i32_0 = arith.constant 0 : i32
    return %arg0, %c0_i32 : i32, i32
  }
  func.func @transform_4(%arg0: i32) -> (i32, i32, i32) {
    %c0_i32 = arith.constant 0 : i32
    %c0_i32_0 = arith.constant 0 : i32
    %c0_i32_1 = arith.constant 0 : i32
    return %c0_i32, %arg0, %c0_i32_0 : i32, i32, i32
  }
}

</mosaic_0001>

<bundles_post_ra>
// kernel: tpu_custom_call.1
= control target key start
LH: loop header
LB: loop body
LE: loop exit
PB: predicated region body
PF: predicated region fallthrough
CT: control target
= control target key end

     0   :  { %9 = vsyncpa [#allocation7], 0  ;;  %s468_s0 = inlined_call_operand.vmem [shape: f32[2,4,16], index: 0, kind: input, shape index: {}]   ;;  %s469_s1 = inlined_call_operand.vmem [shape: f32[8,12], index: 1, kind: input, shape index: {}]   ;;  %s470_s2 = inlined_call_operand.vmem [shape: f32[8,1], index: 2, kind: input, shape index: {}]   ;;  %s471_s3 = inlined_call_operand.vmem [shape: f32[8,1], index: 3, kind: input, shape index: {}]   ;;  %s472_s4 = inlined_call_operand.hbm [shape: f32[2,8,16], index: 4, kind: output, shape index: {}]  }
   0x1   :  { %v53_v0 = vld [vmem:[%s468_s0] sm:$0xff] }
   0x2   :  { %54 = vst [vmem:[#allocation2] sm:$0xff] %v53_v0 }
   0x3   :  { %62 = vsyncadd [#allocation5], 128 }
   0x4   :  { %403 = dma.done.wait [#allocation5], 128 }
   0x5   :  { %404 = vsyncadd [#allocation5], 4294967168  ;;  %vm67_vm0 = vcmask 3072   ;;  %vm70_vm1 = vcmask 142472   ;;  %v407_v1 = vmov 0.0   ;;  %s408_s17 = smov 1  }
   0x6   :  { %68 = vst.msk [vmem:[#allocation3] sm:$0xf] %vm67_vm0, %v407_v1  ;;  %69 = vst.msk [vmem:[#allocation3 + $0x4] sm:$0xf] %vm67_vm0, %v407_v1  ;;  %356 = vmatprep.subr.mxu0 %v407_v1  ;;  %363 = vmatprep.subr.mxu1 %v407_v1  ;;  %vm83_vm2 = vcmask 134152   ;;  %vm88_vm3 = vcmask 125952  }
   0x7   :  { %71 = vst.msk [vmem:[#allocation3] sm:$0xf] %vm70_vm1, %v407_v1  ;;  %72 = vst.msk [vmem:[#allocation3 + $0x4] sm:$0xf] %vm70_vm1, %v407_v1  ;;  %vm409_vm4 = vmmov 0   ;;  %s410_s0 = smov 127  }
   0x8   :  { %360 = vmatprep.mubr.msk.f32.mxu0 %vm409_vm4, %v407_v1  ;;  %367 = vmatprep.mubr.msk.f32.mxu1 %vm409_vm4, %v407_v1  ;;  %s411_s18 = smov 126   ;;  %vm116_vm5 = vcmask 1043456   ;;  %v109_v13 = vld [vmem:[%s469_s1] sm:$0xff]  ;;  %vm112_vm6 = vcmask 97280   ;;  %vm190_vm7 = vcmask 130048   ;;  %v412_v27 = vmov 0  }
   0x9   :  { %v73_v2 = vld [vmem:[#allocation2] sm:$0xf]  ;;  %v74_v3 = vld [vmem:[#allocation2 + $0x4] sm:$0xf]  ;;  %379 = vset.pattern.permute.xlu1 %v412_v27  ;;  %380 = vset.pattern.permute.xlu0 %v412_v27  ;;  %s413_s24 = smov [#allocation6]  }
   0xa   :  { %77 = vrot.lane.b32.xlu0 %v73_v2, %s408_s17  ;;  %v289_v39 = vld [vmem:[%s470_s2] sm:$0xff]  ;;  %s320_s25 = sshll.u32 %s413_s24, 4  ;;  %s321_s25 = int_to_ptr.vmem [resolvable:$true] %s320_s25 }
   0xb   :  { %v293_v42 = vld [vmem:[%s471_s3] sm:$0xff]  ;;  %s383_s2 = scalar_lea.vmem %s321_s25, 256  ;;  %p388_p1 = scmp.lt.s32.totalorder %s321_s25, %s321_s25 }
   0xc   :  { %p384_p0 = scmp.ne.s32.totalorder %s321_s25, %s383_s2  ;;  %p389_p2 = scmp.lt.s32.totalorder %s383_s2, %s383_s2 }
   0xe   :  { %79 = vrot.lane.b32.xlu0 %v74_v3, %s408_s17  ;;  %p390_p3 = por %p389_p2, %p388_p1 }
  0x10   :  { %p391_p4 = pnand %p390_p3, %p384_p0 }
  0x7c   :  { %v78_v4 = vpop.permute.xlu0 %77 }
  0x7d   :  { %84 = vst.msk [vmem:[#allocation3] sm:$0xf] %vm83_vm2, %v78_v4 }
  0x80   :  { %v80_v5 = vpop.permute.xlu0 %79 }
  0x81   :  { %85 = vst.msk [vmem:[#allocation3 + $0x4] sm:$0xf] %vm83_vm2, %v80_v5 }
  0x84   :  { %v86_v6 = vld [vmem:[#allocation3] sm:$0xf] }
  0x85   :  { %93 = vrot.lane.b32.xlu0 %v86_v6, %s410_s0  ;;  %89 = vst.msk [vmem:[#allocation4] sm:$0xf] %vm88_vm3, %v86_v6  ;;  %101 = vrot.lane.b32.xlu1 %v86_v6, %s411_s18 }
  0x88   :  { %v87_v7 = vld [vmem:[#allocation3 + $0x4] sm:$0xf] }
  0x89   :  { %90 = vst.msk [vmem:[#allocation4 + $0x10] sm:$0xf] %vm88_vm3, %v87_v7  ;;  %103 = vrot.lane.b32.xlu1 %v87_v7, %s411_s18 }
  0x8d   :  { %95 = vrot.lane.b32.xlu1 %v87_v7, %s410_s0 }
  0xf7   :  { %v94_v8 = vpop.permute.xlu0 %93  ;;  %v102_v9 = vpop.permute.xlu1 %101 }
  0xf8   :  { %99 = vst.msk [vmem:[#allocation4 + $0x4] sm:$0xf] %vm88_vm3, %v94_v8  ;;  %107 = vst.msk [vmem:[#allocation4 + $0x8] sm:$0xf] %vm88_vm3, %v102_v9 }
  0xfb   :  { %v104_v10 = vpop.permute.xlu1 %103 }
  0xfc   :  { %108 = vst.msk [vmem:[#allocation4 + $0x18] sm:$0xf] %vm88_vm3, %v104_v10 }
  0xff   :  { %v96_v11 = vpop.permute.xlu1 %95  ;;  %v111_v12 = vld [vmem:[#allocation4 + $0x8] sm:$0xf]  ;;  %v110_v14 = vld [vmem:[#allocation4] sm:$0xff] }
 0x100   :  { %100 = vst.msk [vmem:[#allocation4 + $0x14] sm:$0xf] %vm88_vm3, %v96_v11  ;;  %357 = vmatpush3.msk.msra.mxu0 %vm116_vm5, %v111_v12 }
 0x101   :  { %358 = vmatprep.subr.mxu0 %v407_v1 }
 0x102   :  { %359 = vmatpush3.msra.mxu0 %v110_v14 }
 0x103   :  { %361 = vmatmul.mubr.msk.f32.vlgmr.msra.gmra.mxu0 %vm112_vm6, %v109_v13  ;;  %v202_v15 = vld [vmem:[#allocation4 + $0x18] sm:$0xf] }
 0x104   :  { %364 = vmatpush3.msk.msra.mxu1 %vm116_vm5, %v202_v15 }
 0x105   :  { %365 = vmatprep.subr.mxu1 %v407_v1 }
 0x107   :  { %v201_v16 = vld [vmem:[#allocation4 + $0x10] sm:$0xff] }
 0x108   :  { %366 = vmatpush3.msra.mxu1 %v201_v16 }
 0x109   :  { %368 = vmatmul.mubr.msk.f32.vlgmr.msra.gmra.mxu1 %vm112_vm6, %v109_v13 }
 0x1c3   :  { %v186_v17 = vpop.f32.mrf.mxu0 }
 0x1c4   :  { %v191_v18 = vsel %vm190_vm7, %v186_v17, 0.0  ;;  %v195_v19 = vmul.f32 %v186_v17, %v186_v17 }
 0x1c5   :  { %192 = vadd.xlane.f32.xlu0 %v191_v18  ;;  %v362_v20 = vpop.f32.mrf.mxu0 }
 0x1c6   :  { %v196_v21 = vsel %vm190_vm7, %v195_v19, 0.0 }
 0x1c9   :  { %v272_v22 = vpop.f32.mrf.mxu1  ;;  %197 = vadd.xlane.f32.xlu0 %v196_v21 }
 0x1ca   :  { %v276_v23 = vsel %vm190_vm7, %v272_v22, 0.0  ;;  %v280_v24 = vmul.f32 %v272_v22, %v272_v22 }
 0x1cb   :  { %277 = vadd.xlane.f32.xlu1 %v276_v23  ;;  %v369_v25 = vpop.f32.mrf.mxu1 }
 0x1cc   :  { %v281_v26 = vsel %vm190_vm7, %v280_v24, 0.0 }
 0x1cd   :  { %282 = vadd.xlane.f32.xlu0 %v281_v26 }
 0x24e   :  { %v193_v28 = vpop.xlane.xlu0 %192 }
 0x252   :  { %v198_v29 = vpop.xlane.xlu0 %197 }
 0x254   :  { %v278_v30 = vpop.xlane.xlu1 %277 }
 0x255   :  { %v279_v31 = vadd.f32 %v278_v30, %v193_v28 }
 0x256   :  { %v283_v32 = vpop.xlane.xlu0 %282 }
 0x257   :  { %v285_v33 = vmul.f32 0.03125, %v279_v31  ;;  %v284_v34 = vadd.f32 %v283_v32, %v198_v29 }
 0x259   :  { %v287_v35 = vmul.f32 %v285_v33, %v285_v33  ;;  %v286_v36 = vmul.f32 0.03125, %v284_v34 }
 0x25b   :  { %v288_v37 = vsub.f32 %v286_v36, %v287_v35 }
 0x25d   :  { %v290_v38 = vadd.f32 1e-05, %v288_v37 }
 0x25f   :  { %381 = vrsqrt.f32 %v290_v38 }
 0x26c   :  { %v382_v40 = vpop.eup %381 }
 0x26d   :  { %v292_v41 = vmul.f32 %v382_v40, %v289_v39 }
 0x26f   :  { %298 = vperm.xlu1 %379, %v292_v41   ;;  %v294_v43 = vmul.f32 %v292_v41, %v285_v33 }
 0x271   :  { %v295_v44 = vsub.f32 %v293_v42, %v294_v43 }
 0x273   :  { %304 = vperm.xlu0 %380, %v295_v44  }
 0x2ea   :  { %v299_v45 = vpop.permute.xlu1 %298 }
 0x2eb   :  { %v301_v46 = vmul.f32 %v299_v45, %v186_v17  ;;  %v310_v47 = vmul.f32 %v299_v45, %v272_v22 }
 0x2ee   :  { %v305_v48 = vpop.permute.xlu0 %304 }
 0x2ef   :  { %v307_v49 = vadd.f32 %v305_v48, %v301_v46  ;;  %v311_v50 = vadd.f32 %v310_v47, %v305_v48 }
 0x2f1   :  { %v308_v51 = vmax.f32 %v307_v49, 0.0  ;;  %v312_v52 = vmax.f32 %v311_v50, 0.0 }
 0x2f3   :  { %309 = vst.msk [vmem:[#allocation6] sm:$0xff] %vm190_vm7, %v308_v51  ;;  %314 = vst.msk [vmem:[#allocation6 + $0x8] sm:$0xff] %vm190_vm7, %v312_v52 }
 0x2f4   :  { %394 = shalt.err (!%p391_p4)
}
 0x2f5   :  { %s414_s3 = smov 128   ;;  %s415_s26 = smov 8  }
 0x2f6   :  { %326 = dma.vmem_to_hbm [thread:$0]  %s321_s25, 256, %s472_s4, [#allocation7], %s414_s3, %s414_s3, %s415_s26  }
 0x2f7   :  { %405 = dma.done.wait [#allocation7], 256  }
 0x2f8   :  { %406 = vsyncadd [#allocation7], 4294967040 }
 0x2f9   :  { %330 = vsyncpa [#allocation7], 1 }
 0x2fa   :  { %331 = vsyncmov [#allocation5] }
 0x2fd   :  { %s332_s29 = vpop.sfrf %331 }
 0x2fe   :  { %p349_p5 = scmp.ne.s32.totalorder %s332_s29, 0 }
 0x300   :  { %336 = shalt.err (%p349_p5)  }

</bundles_post_ra>
